<compile_context>
chip_gen: v6e
topology: v6e:2x2x1
jax: 0.10.0
libtpu: 0.0.40
codegen_flags: <defaults>
</compile_context>

<pallas_src>
import functools

import jax
import jax.numpy as jnp
from jax.experimental import pallas as pl
from jax.experimental.pallas import tpu as pltpu


def _round_up(x, m):
    return ((x + m - 1) // m) * m


def siamese_kernel(s_ref, n_ref, w1a_ref, w1b_ref, b1_ref, w2_ref, b2_ref,
                   out_ref):
    a = out_ref.shape[-1]
    # Layer 1: two half-matmuls replace the concatenated [B,2D] @ [2D,H]
    # (concat never touches HBM; accumulation in f32 on the MXU).
    h = jnp.dot(s_ref[...], w1a_ref[...], preferred_element_type=jnp.float32)
    h = h + jnp.dot(n_ref[...], w1b_ref[...], preferred_element_type=jnp.float32)
    h = jnp.maximum(h + b1_ref[...], 0.0)                       # ReLU, f32
    # Layer 2: logits over the lane-padded action dim. Padded w2 columns are
    # zero and padded b2 entries are -1e30 (f32), so exp() underflows to 0 and
    # they contribute nothing to the row max or the denominator.
    logits = jnp.dot(h.astype(w2_ref.dtype), w2_ref[...],
                     preferred_element_type=jnp.float32) + b2_ref[...]
    # Numerically-stable softmax in f32, exact normalization (probabilities
    # typically feed sampling / KL terms downstream).
    m = jnp.max(logits, axis=-1, keepdims=True)
    e = jnp.exp(logits - m)
    probs = e / jnp.sum(e, axis=-1, keepdims=True)
    # Store only the real action columns -> narrow (tb, A) HBM writeback.
    out_ref[...] = probs[:, :a].astype(out_ref.dtype)


@functools.partial(jax.jit, static_argnames=("block_b", "compute_dtype"))
def siamese_forward(state_emb, next_state_emb, params, *,
                    block_b=1024, compute_dtype=jnp.bfloat16):
    """state_emb, next_state_emb: [B, D] -> action probs [B, A] (float32)."""
    w1, b1, w2, b2 = params
    B, D = state_emb.shape
    H = w1.shape[1]
    A = w2.shape[1]

    # Split the first-layer weight so the concat never materializes in HBM.
    w1a = w1[:D].astype(compute_dtype)
    w1b = w1[D:].astype(compute_dtype)
    s = state_emb.astype(compute_dtype)
    n = next_state_emb.astype(compute_dtype)

    # Pad the action dim of the second layer to a lane multiple for the MXU.
    # Invariant: padded w2 columns are ZERO and padded b2 entries are -1e30 in
    # f32 (b2 is never cast down), so padded logits vanish in the softmax.
    A_pad = _round_up(max(A, 128), 128)
    if A_pad != A:
        w2 = jnp.pad(w2, ((0, 0), (0, A_pad - A)))
        b2 = jnp.pad(b2, ((0, 0), (0, A_pad - A)), constant_values=-1e30)
    w2 = w2.astype(compute_dtype)
    b1 = b1.astype(jnp.float32)
    b2 = b2.astype(jnp.float32)

    # Batch tiling: large tiles amortize per-step overhead; keep >= 2 grid
    # steps when the batch is big enough so both v7x TensorCores get work.
    tb = min(block_b, B)
    if B > 32:
        tb = min(tb, _round_up(pl.cdiv(B, 2), 16))
    if tb < B:
        tb = _round_up(tb, 16)          # bf16 min sublane tile
    grid = (pl.cdiv(B, tb),)
    # Ragged last block (no jnp.pad of the batch): out-of-range rows read
    # garbage, but matmul rows and softmax are row-local and the out-of-range
    # writes are masked, so in-range rows are unaffected.

    itemsize = jnp.dtype(compute_dtype).itemsize
    cost = pl.CostEstimate(
        flops=2 * B * (2 * D * H + H * A_pad),
        transcendentals=B * A_pad,
        bytes_accessed=(2 * B * D * itemsize                    # activations in
                        + (2 * D * H + H * A_pad) * itemsize    # weights
                        + (H + A_pad) * 4                       # biases
                        + B * A * 4),                           # probs out
    )

    out = pl.pallas_call(
        siamese_kernel,
        out_shape=jax.ShapeDtypeStruct((B, A), jnp.float32),
        grid=grid,
        in_specs=[
            pl.BlockSpec((tb, D), lambda i: (i, 0)),      # state_emb tile
            pl.BlockSpec((tb, D), lambda i: (i, 0)),      # next_state_emb tile
            pl.BlockSpec((D, H), lambda i: (0, 0)),       # weights: VMEM-resident
            pl.BlockSpec((D, H), lambda i: (0, 0)),
            pl.BlockSpec((1, H), lambda i: (0, 0)),
            pl.BlockSpec((H, A_pad), lambda i: (0, 0)),
            pl.BlockSpec((1, A_pad), lambda i: (0, 0)),
        ],
        out_specs=pl.BlockSpec((tb, A), lambda i: (i, 0)),
        compiler_params=pltpu.CompilerParams(
            dimension_semantics=("parallel",),            # batch axis shards on v7x
        ),
        cost_estimate=cost,
    )(s, n, w1a, w1b, b1, w2, b2)
    return out


def init_params(key, in_state, hidden, out_action):
    """Deterministic PyTorch-style (uniform +-1/sqrt(fan_in)) init."""
    k1, k2, k3, k4 = jax.random.split(key, 4)
    fan1 = 2 * in_state
    lim1 = 1.0 / jnp.sqrt(fan1)
    w1 = jax.random.uniform(k1, (fan1, hidden), jnp.float32, -lim1, lim1)
    b1 = jax.random.uniform(k2, (1, hidden), jnp.float32, -lim1, lim1)
    lim2 = 1.0 / jnp.sqrt(hidden)
    w2 = jax.random.uniform(k3, (hidden, out_action), jnp.float32, -lim2, lim2)
    b2 = jax.random.uniform(k4, (1, out_action), jnp.float32, -lim2, lim2)
    return w1, b1, w2, b2


def reference_forward(state_emb, next_state_emb, params):
    w1, b1, w2, b2 = params
    emb = jnp.concatenate([state_emb, next_state_emb], axis=-1)
    h = jnp.maximum(emb @ w1 + b1, 0.0)
    logits = h @ w2 + b2
    return jax.nn.softmax(logits, axis=-1)


if __name__ == "__main__":
    B = 2           # batch
    in_state = 32   # per-state embedding dim
    hidden = 64     # MLP hidden width
    out_action = 8  # number of actions

    key = jax.random.PRNGKey(0)
    kp, ks, kn = jax.random.split(key, 3)
    params = init_params(kp, in_state, hidden, out_action)

    state_emb = jax.random.normal(ks, (B, in_state), jnp.float32)
    next_state_emb = jax.random.normal(kn, (B, in_state), jnp.float32)

    ref = reference_forward(state_emb, next_state_emb, params)

    # Strict numerical check on the f32 compute path.
    out_f32 = siamese_forward(state_emb, next_state_emb, params,
                              compute_dtype=jnp.float32)
    out_f32 = jax.block_until_ready(out_f32)
    assert out_f32.shape == (B, out_action)
    assert jnp.allclose(jnp.sum(out_f32, axis=-1), 1.0, atol=1e-4)
    assert jnp.allclose(out_f32, ref, atol=1e-5, rtol=1e-5)

    # Default (bf16 matmul operands) fast path: rows still sum to 1 exactly
    # (f32 softmax + exact division); values match to bf16-level tolerance.
    out_bf16 = siamese_forward(state_emb, next_state_emb, params)
    out_bf16 = jax.block_until_ready(out_bf16)
    assert out_bf16.shape == (B, out_action)
    assert jnp.allclose(jnp.sum(out_bf16, axis=-1), 1.0, atol=1e-4)
    assert jnp.allclose(out_bf16, ref, atol=2e-2, rtol=2e-2)

    print("KERNEL_OK")
</pallas_src>

<mosaic_0001>
module attributes {stable_mosaic.version = 11 : i64} {
  func.func @siamese_kernel(%arg0: i32, %arg1: memref<2x32xf32, #tpu.memory_space<vmem>>, %arg2: memref<2x32xf32, #tpu.memory_space<vmem>>, %arg3: memref<32x64xf32, #tpu.memory_space<vmem>>, %arg4: memref<32x64xf32, #tpu.memory_space<vmem>>, %arg5: memref<1x64xf32, #tpu.memory_space<vmem>>, %arg6: memref<64x128xf32, #tpu.memory_space<vmem>>, %arg7: memref<1x128xf32, #tpu.memory_space<vmem>>, %arg8: memref<2x8xf32, #tpu.memory_space<vmem>>) attributes {dimension_semantics = [#tpu.dimension_semantics<parallel>], iteration_bounds = array<i64: 1>, scalar_prefetch = 0 : i64, scratch_operands = 0 : i64, tpu.core_type = #tpu.core_type<tc>, window_params = [{transform_indices = @transform_0, window_bounds = array<i64: 2, 32>}, {transform_indices = @transform_1, window_bounds = array<i64: 2, 32>}, {pipeline_mode = #tpu.pipeline_mode<synchronous>, transform_indices = @transform_2, window_bounds = array<i64: 32, 64>}, {pipeline_mode = #tpu.pipeline_mode<synchronous>, transform_indices = @transform_3, window_bounds = array<i64: 32, 64>}, {pipeline_mode = #tpu.pipeline_mode<synchronous>, transform_indices = @transform_4, window_bounds = array<i64: 1, 64>}, {pipeline_mode = #tpu.pipeline_mode<synchronous>, transform_indices = @transform_5, window_bounds = array<i64: 64, 128>}, {pipeline_mode = #tpu.pipeline_mode<synchronous>, transform_indices = @transform_6, window_bounds = array<i64: 1, 128>}, {transform_indices = @transform_7, window_bounds = array<i64: 2, 8>}]} {
    %c0 = arith.constant 0 : index
    %c0_0 = arith.constant 0 : index
    %0 = vector.load %arg1[%c0, %c0_0] : memref<2x32xf32, #tpu.memory_space<vmem>>, vector<2x32xf32>
    %c0_1 = arith.constant 0 : index
    %c0_2 = arith.constant 0 : index
    %1 = vector.load %arg3[%c0_1, %c0_2] : memref<32x64xf32, #tpu.memory_space<vmem>>, vector<32x64xf32>
    %cst = arith.constant dense<0.000000e+00> : vector<2x64xf32>
    %2 = tpu.matmul %0, %1, %cst {dimension_numbers = #tpu.dot_dimension_numbers<[1], [0], [0], [1], [0, 0, 1, 1], [], []>} : vector<2x32xf32>, vector<32x64xf32>, vector<2x64xf32> -> vector<2x64xf32>
    %c0_3 = arith.constant 0 : index
    %c0_4 = arith.constant 0 : index
    %3 = vector.load %arg2[%c0_3, %c0_4] : memref<2x32xf32, #tpu.memory_space<vmem>>, vector<2x32xf32>
    %c0_5 = arith.constant 0 : index
    %c0_6 = arith.constant 0 : index
    %4 = vector.load %arg4[%c0_5, %c0_6] : memref<32x64xf32, #tpu.memory_space<vmem>>, vector<32x64xf32>
    %cst_7 = arith.constant dense<0.000000e+00> : vector<2x64xf32>
    %5 = tpu.matmul %3, %4, %cst_7 {dimension_numbers = #tpu.dot_dimension_numbers<[1], [0], [0], [1], [0, 0, 1, 1], [], []>} : vector<2x32xf32>, vector<32x64xf32>, vector<2x64xf32> -> vector<2x64xf32>
    %6 = arith.addf %2, %5 : vector<2x64xf32>
    %c0_8 = arith.constant 0 : index
    %c0_9 = arith.constant 0 : index
    %7 = vector.load %arg5[%c0_8, %c0_9] : memref<1x64xf32, #tpu.memory_space<vmem>>, vector<1x64xf32>
    %8 = vector.broadcast %7 : vector<1x64xf32> to vector<2x64xf32>
    %9 = arith.addf %6, %8 : vector<2x64xf32>
    %cst_10 = arith.constant 0.000000e+00 : f32
    %10 = vector.broadcast %cst_10 : f32 to vector<2x64xf32>
    %11 = arith.maximumf %9, %10 : vector<2x64xf32>
    %c0_11 = arith.constant 0 : index
    %c0_12 = arith.constant 0 : index
    %12 = vector.load %arg6[%c0_11, %c0_12] : memref<64x128xf32, #tpu.memory_space<vmem>>, vector<64x128xf32>
    %cst_13 = arith.constant dense<0.000000e+00> : vector<2x128xf32>
    %13 = tpu.matmul %11, %12, %cst_13 {dimension_numbers = #tpu.dot_dimension_numbers<[1], [0], [0], [1], [0, 0, 1, 1], [], []>} : vector<2x64xf32>, vector<64x128xf32>, vector<2x128xf32> -> vector<2x128xf32>
    %c0_14 = arith.constant 0 : index
    %c0_15 = arith.constant 0 : index
    %14 = vector.load %arg7[%c0_14, %c0_15] : memref<1x128xf32, #tpu.memory_space<vmem>>, vector<1x128xf32>
    %15 = vector.broadcast %14 : vector<1x128xf32> to vector<2x128xf32>
    %16 = arith.addf %13, %15 : vector<2x128xf32>
    %cst_16 = arith.constant dense<0xFF800000> : vector<2xf32>
    %17 = vector.multi_reduction <maximumf>, %16, %cst_16 [1] : vector<2x128xf32> to vector<2xf32>
    %18 = vector.shape_cast %17 : vector<2xf32> to vector<2x1xf32>
    %19 = vector.broadcast %18 : vector<2x1xf32> to vector<2x128xf32>
    %20 = arith.subf %16, %19 : vector<2x128xf32>
    %21 = math.exp %20 : vector<2x128xf32>
    %cst_17 = arith.constant dense<0.000000e+00> : vector<2xf32>
    %22 = vector.multi_reduction <add>, %21, %cst_17 [1] : vector<2x128xf32> to vector<2xf32>
    %23 = vector.shape_cast %22 : vector<2xf32> to vector<2x1xf32>
    %24 = vector.broadcast %23 : vector<2x1xf32> to vector<2x128xf32>
    %25 = arith.divf %21, %24 : vector<2x128xf32>
    %26 = vector.extract_strided_slice %25 {offsets = [0, 0], sizes = [2, 8], strides = [1, 1]} : vector<2x128xf32> to vector<2x8xf32>
    %c0_18 = arith.constant 0 : index
    %c0_19 = arith.constant 0 : index
    %27 = vector.load %arg8[%c0_18, %c0_19] : memref<2x8xf32, #tpu.memory_space<vmem>>, vector<2x8xf32>
    tpu.vector_store %arg8[%c0_18, %c0_19], %26 {strides = array<i32>} : memref<2x8xf32, #tpu.memory_space<vmem>>, vector<2x8xf32>,
    return
  }
  func.func @transform_0(%arg0: i32) -> (i32, i32) {
    %c0_i32 = arith.constant 0 : i32
    %c0_i32_0 = arith.constant 0 : i32
    return %arg0, %c0_i32 : i32, i32
  }
  func.func @transform_1(%arg0: i32) -> (i32, i32) {
    %c0_i32 = arith.constant 0 : i32
    %c0_i32_0 = arith.constant 0 : i32
    return %arg0, %c0_i32 : i32, i32
  }
  func.func @transform_2(%arg0: i32) -> (i32, i32) {
    %c0_i32 = arith.constant 0 : i32
    %c0_i32_0 = arith.constant 0 : i32
    %c0_i32_1 = arith.constant 0 : i32
    return %c0_i32, %c0_i32_0 : i32, i32
  }
  func.func @transform_3(%arg0: i32) -> (i32, i32) {
    %c0_i32 = arith.constant 0 : i32
    %c0_i32_0 = arith.constant 0 : i32
    %c0_i32_1 = arith.constant 0 : i32
    return %c0_i32, %c0_i32_0 : i32, i32
  }
  func.func @transform_4(%arg0: i32) -> (i32, i32) {
    %c0_i32 = arith.constant 0 : i32
    %c0_i32_0 = arith.constant 0 : i32
    %c0_i32_1 = arith.constant 0 : i32
    return %c0_i32, %c0_i32_0 : i32, i32
  }
  func.func @transform_5(%arg0: i32) -> (i32, i32) {
    %c0_i32 = arith.constant 0 : i32
    %c0_i32_0 = arith.constant 0 : i32
    %c0_i32_1 = arith.constant 0 : i32
    return %c0_i32, %c0_i32_0 : i32, i32
  }
  func.func @transform_6(%arg0: i32) -> (i32, i32) {
    %c0_i32 = arith.constant 0 : i32
    %c0_i32_0 = arith.constant 0 : i32
    %c0_i32_1 = arith.constant 0 : i32
    return %c0_i32, %c0_i32_0 : i32, i32
  }
  func.func @transform_7(%arg0: i32) -> (i32, i32) {
    %c0_i32 = arith.constant 0 : i32
    %c0_i32_0 = arith.constant 0 : i32
    return %arg0, %c0_i32 : i32, i32
  }
}

</mosaic_0001>

<bundles_post_ra>
// kernel: siamese_forward.1
= control target key start
LH: loop header
LB: loop body
LE: loop exit
PB: predicated region body
PF: predicated region fallthrough
CT: control target
= control target key end

     0   :  { %v404_v1 = vmov 0.0   ;;  %vm405_vm0 = vmmov 0   ;;  %s515_s0 = inlined_call_operand.vmem [shape: f32[2,32], index: 0, kind: input, shape index: {}]   ;;  %s516_s1 = inlined_call_operand.vmem [shape: f32[2,32], index: 1, kind: input, shape index: {}]   ;;  %s517_s2 = inlined_call_operand.vmem [shape: f32[32,64], index: 2, kind: input, shape index: {}]   ;;  %s518_s3 = inlined_call_operand.vmem [shape: f32[32,64], index: 3, kind: input, shape index: {}]   ;;  %s519_s4 = inlined_call_operand.vmem [shape: f32[1,64], index: 4, kind: input, shape index: {}]   ;;  %s520_s5 = inlined_call_operand.vmem [shape: f32[64,128], index: 5, kind: input, shape index: {}]   ;;  %s521_s6 = inlined_call_operand.vmem [shape: f32[1,128], index: 6, kind: input, shape index: {}]   ;;  %s522_s7 = inlined_call_operand.hbm [shape: f32[2,8], index: 7, kind: output, shape index: {}]  }
   0x1   :  { %v36_v0 = vld [vmem:[%s518_s3 + $0x18] sm:$0xff]  ;;  %334 = vmatprep.subr.mxu1 %v404_v1  ;;  %v35_v2 = vld [vmem:[%s518_s3 + $0x10] sm:$0xff]  ;;  %342 = vmatprep.mubr.msk.f32.mxu1 %vm405_vm0, %v404_v1  ;;  %v34_v3 = vld [vmem:[%s518_s3 + $0x8] sm:$0xff] }
   0x2   :  { %335 = vmatpush3.msra.mxu1 %v36_v0  ;;  %356 = vmatprep.subr.mxu0 %v404_v1 }
   0x3   :  { %336 = vmatprep.subr.mxu1 %v404_v1  ;;  %372 = vmatprep.mubr.msk.f32.mxu0 %vm405_vm0, %v404_v1 }
   0x4   :  { %12 = vsyncpa [#allocation3], 0  ;;  %337 = vmatpush3.msra.mxu1 %v35_v2  ;;  %v33_v4 = vld [vmem:[%s518_s3] sm:$0xff]  ;;  %vm37_vm1 = vcmask 261120   ;;  %v31_v6 = vld [vmem:[%s517_s2 + $0x18] sm:$0xff]  ;;  %vm208_vm2 = vcmask 523264  }
   0x5   :  { %338 = vmatprep.subr.mxu1 %v404_v1  ;;  %v32_v5 = vld [vmem:[%s516_s1] sm:$0x3]  ;;  %v30_v7 = vld [vmem:[%s517_s2 + $0x10] sm:$0xff]  ;;  %v29_v8 = vld [vmem:[%s517_s2 + $0x8] sm:$0xff]  ;;  %vm282_vm3 = vcmask 1041408   ;;  %vm294_vm4 = vcmask 58368  }
   0x6   :  { %339 = vmatpush3.msra.mxu1 %v34_v3  ;;  %v28_v9 = vld [vmem:[%s517_s2] sm:$0xff]  ;;  %v200_v11 = vld [vmem:[%s520_s5 + $0x38] sm:$0xff]  ;;  %v199_v12 = vld [vmem:[%s520_s5 + $0x30] sm:$0xff] }
   0x7   :  { %340 = vmatprep.subr.mxu1 %v404_v1  ;;  %v27_v10 = vld [vmem:[%s515_s0] sm:$0x3]  ;;  %357 = vmatpush3.msra.mxu0 %v200_v11  ;;  %v198_v13 = vld [vmem:[%s520_s5 + $0x28] sm:$0xff]  ;;  %v196_v15 = vld [vmem:[%s520_s5 + $0x18] sm:$0xff] }
   0x8   :  { %341 = vmatpush3.msra.mxu1 %v33_v4  ;;  %358 = vmatprep.subr.mxu0 %v404_v1  ;;  %v197_v14 = vld [vmem:[%s520_s5 + $0x20] sm:$0xff]  ;;  %v195_v16 = vld [vmem:[%s520_s5 + $0x10] sm:$0xff]  ;;  %v194_v17 = vld [vmem:[%s520_s5 + $0x8] sm:$0xff] }
   0x9   :  { %343 = vmatmul.mubr.msk.f32.vlgmr.msra.gmra.mxu1 %vm37_vm1, %v32_v5  ;;  %345 = vmatprep.subr.mxu1 %v404_v1  ;;  %v193_v18 = vld [vmem:[%s520_s5] sm:$0xff] }
   0xa   :  { %346 = vmatpush3.msra.mxu1 %v31_v6  ;;  %353 = vmatprep.mubr.msk.f32.mxu1 %vm405_vm0, %v404_v1  ;;  %v312_v22 = vld [vmem:[%s519_s4] ss:$0 sm:$0xff]  ;;  %s406_s4 = smov [#allocation2]  }
   0xb   :  { %347 = vmatprep.subr.mxu1 %v404_v1  ;;  %359 = vmatpush3.msra.mxu0 %v199_v12  ;;  %v313_v27 = vld [vmem:[%s521_s6] ss:$0 sm:$0xff]  ;;  %s302_s5 = sshll.u32 %s406_s4, 4  ;;  %s303_s5 = int_to_ptr.vmem [resolvable:$true] %s302_s5 }
   0xc   :  { %348 = vmatpush3.msra.mxu1 %v30_v7  ;;  %360 = vmatprep.subr.mxu0 %v404_v1  ;;  %s382_s6 = scalar_lea.vmem %s303_s5, 32  ;;  %p387_p1 = scmp.lt.s32.totalorder %s303_s5, %s303_s5 }
   0xd   :  { %349 = vmatprep.subr.mxu1 %v404_v1  ;;  %361 = vmatpush3.msra.mxu0 %v198_v13  ;;  %p383_p0 = scmp.ne.s32.totalorder %s303_s5, %s382_s6  ;;  %p388_p2 = scmp.lt.s32.totalorder %s382_s6, %s382_s6 }
   0xe   :  { %350 = vmatpush3.msra.mxu1 %v29_v8  ;;  %362 = vmatprep.subr.mxu0 %v404_v1 }
   0xf   :  { %351 = vmatprep.subr.mxu1 %v404_v1  ;;  %363 = vmatpush3.msra.mxu0 %v197_v14  ;;  %p389_p3 = por %p388_p2, %p387_p1 }
  0x10   :  { %352 = vmatpush3.msra.mxu1 %v28_v9  ;;  %364 = vmatprep.subr.mxu0 %v404_v1 }
  0x11   :  { %354 = vmatmul.mubr.msk.f32.vlgmr.msra.gmra.mxu1 %vm37_vm1, %v27_v10  ;;  %365 = vmatpush3.msra.mxu0 %v196_v15  ;;  %p390_p4 = pnand %p389_p3, %p383_p0 }
  0x12   :  { %366 = vmatprep.subr.mxu0 %v404_v1 }
  0x13   :  { %367 = vmatpush3.msra.mxu0 %v195_v16 }
  0x14   :  { %368 = vmatprep.subr.mxu0 %v404_v1 }
  0x15   :  { %369 = vmatpush3.msra.mxu0 %v194_v17 }
  0x16   :  { %370 = vmatprep.subr.mxu0 %v404_v1 }
  0x17   :  { %371 = vmatpush3.msra.mxu0 %v193_v18 }
  0xc9   :  { %v107_v19 = vpop.f32.mrf.mxu1 }
  0xcb   :  { %v344_v20 = vpop.f32.mrf.mxu1 }
  0xd1   :  { %v180_v21 = vpop.f32.mrf.mxu1 }
  0xd2   :  { %v181_v23 = vadd.f32 %v180_v21, %v107_v19 }
  0xd3   :  { %v355_v24 = vpop.f32.mrf.mxu1 }
  0xd4   :  { %v191_v25 = vadd.f32 %v312_v22, %v181_v23 }
  0xd6   :  { %v192_v26 = vmax.f32 %v191_v25, 0.0 }
  0xd8   :  { %373 = vmatmul.mubr.msk.f32.vlgmr.msra.gmra.mxu0 %vm208_vm2, %v192_v26 }
 0x198   :  { %v278_v28 = vpop.f32.mrf.mxu0 }
 0x199   :  { %v279_v29 = vadd.f32 %v313_v27, %v278_v28 }
 0x19a   :  { %v374_v30 = vpop.f32.mrf.mxu0 }
 0x19b   :  { %v283_v31 = vsel %vm282_vm3, %v279_v29, -inf }
 0x19c   :  { %284 = vmax.xlane.f32.xlu0 %v283_v31 }
 0x225   :  { %v285_v32 = vpop.xlane.xlu0 %284 }
 0x226   :  { %v286_v33 = vsub.f32 %v279_v29, %v285_v32 }
 0x228   :  { %v287_v34 = vmul.f32 1.442695, %v286_v33 }
 0x22a   :  { %378 = vpow2.f32 %v287_v34 }
 0x237   :  { %v379_v35 = vpop.eup %378 }
 0x238   :  { %v289_v36 = vsel %vm282_vm3, %v379_v35, 0.0 }
 0x239   :  { %290 = vadd.xlane.f32.xlu0 %v289_v36 }
 0x2c2   :  { %v291_v37 = vpop.xlane.xlu0 %290 }
 0x2c3   :  { %380 = vrcp.f32 %v291_v37 }
 0x2d0   :  { %v381_v38 = vpop.eup %380 }
 0x2d1   :  { %v293_v39 = vmul.f32 %v381_v38, %v379_v35 }
 0x2d3   :  { %295 = vst.msk [vmem:[#allocation2] sm:$0x3] %vm294_vm4, %v293_v39 }
 0x2d4   :  { %393 = shalt.err (!%p390_p4)
}
 0x2d5   :  { %305 = dma.vmem_to_hbm [thread:$0]  %s303_s5, 32, %s522_s7, [#allocation3]  }
 0x2d6   :  { %402 = dma.done.wait [#allocation3], 32  }
 0x2d7   :  { %403 = vsyncadd [#allocation3], 4294967264 }
 0x2d8   :  { %309 = vsyncpa [#allocation3], 1 }

</bundles_post_ra>
